<compile_context>
chip_gen: v5e
topology: v5e:2x2
jax: 0.10.0
libtpu: 0.0.40
codegen_flags: <defaults>
</compile_context>

<pallas_src>
import functools
import math

import jax
import jax.numpy as jnp
from jax import lax
from jax.experimental import pallas as pl
from jax.experimental.pallas import tpu as pltpu

LN_EPS = 1e-5


def _mha_kernel(x_ref, gamma_ref, beta_ref, wqkv_ref, bqkv_ref, wp_ref, bp_ref,
                o_ref, attn_scratch,
                *, num_heads: int, head_dim: int, compute_dtype, approx_recip: bool):
    """One batch element per grid step. All elementwise math in f32."""
    E = num_heads * head_dim
    x = x_ref[0]                                        # (N, E) f32
    res = x

    # ---- LayerNorm over the embedding axis ----
    mean = jnp.mean(x, axis=-1, keepdims=True)
    var = jnp.mean((x - mean) ** 2, axis=-1, keepdims=True)
    xn = (x - mean) * lax.rsqrt(var + LN_EPS)
    xn = xn * gamma_ref[...] + beta_ref[...]            # gamma/beta are (1, E)

    # ---- Fused QKV projection: single MXU pass, single bias add ----
    # (attention scaling is pre-folded into the q columns / q bias)
    qkv = jnp.dot(xn.astype(compute_dtype), wqkv_ref[...],
                  preferred_element_type=jnp.float32) + bqkv_ref[...]   # (N, 3E) f32
    qkv_c = qkv.astype(compute_dtype)
    q = qkv_c[:, :E]
    k = qkv_c[:, E:2 * E]
    v = qkv_c[:, 2 * E:]

    # ---- Per-head attention; each head writes its slice into VMEM scratch ----
    for h in range(num_heads):
        sl = slice(h * head_dim, (h + 1) * head_dim)
        qh, kh, vh = q[:, sl], k[:, sl], v[:, sl]       # (N, d), compute dtype
        # energy = q @ k^T, contracting the last dims (no transposed copy of k).
        energy = lax.dot_general(
            qh, kh, dimension_numbers=(((1,), (1,)), ((), ())),
            preferred_element_type=jnp.float32)         # (N, N) f32
        # Numerically-stable softmax in f32; divide handled on the EUP.
        m = jnp.max(energy, axis=-1, keepdims=True)
        p = jnp.exp(energy - m)
        denom = jnp.sum(p, axis=-1, keepdims=True)
        if approx_recip:
            att = p * pl.reciprocal(denom, approx=True)
        else:
            att = p / denom
        # att_drop: identity (eval mode)
        head_out = jnp.dot(att.astype(compute_dtype), vh,
                           preferred_element_type=jnp.float32)          # (N, d)
        attn_scratch[:, sl] = head_out                  # 'b h n d -> b n (h d)'

    # ---- Output projection + residual ----
    out = attn_scratch[...].astype(compute_dtype)       # (N, E)
    proj = jnp.dot(out, wp_ref[...],
                   preferred_element_type=jnp.float32) + bp_ref[...]
    # mlp_drop: identity (eval mode)
    o_ref[0] = (proj + res).astype(o_ref.dtype)


def mha_forward(x, params, *, num_heads: int, compute_dtype=jnp.bfloat16):
    """x: (B, N, E) float32. params: dict from make_params()[0]."""
    B, N, E = x.shape
    head_dim = E // num_heads
    assert head_dim * num_heads == E

    approx_recip = jnp.dtype(compute_dtype) != jnp.dtype(jnp.float32)
    kernel = functools.partial(_mha_kernel,
                               num_heads=num_heads,
                               head_dim=head_dim,
                               compute_dtype=compute_dtype,
                               approx_recip=approx_recip)

    # DMA the weights in the matmul compute dtype (half the bytes for bf16).
    wqkv = params["Wqkv"].astype(compute_dtype)
    wp = params["Wp"].astype(compute_dtype)

    def full(shape):
        return pl.BlockSpec(shape, lambda b: (0,) * len(shape))

    # Advisory cost estimate: qkv proj + attention (QK^T, att@V) + out proj.
    flops = 2 * B * N * E * (3 * E + E) + 4 * B * N * N * E
    transcendentals = B * num_heads * N * N                     # exp in softmax
    bytes_accessed = (2 * B * N * E + 6 * E) * 4 \
        + int(wqkv.size + wp.size) * jnp.dtype(compute_dtype).itemsize

    return pl.pallas_call(
        kernel,
        out_shape=jax.ShapeDtypeStruct((B, N, E), x.dtype),
        grid_spec=pltpu.PrefetchScalarGridSpec(
            num_scalar_prefetch=0,
            grid=(B,),
            in_specs=[
                pl.BlockSpec((1, N, E), lambda b: (b, 0, 0)),   # x
                full((1, E)),            # gamma
                full((1, E)),            # beta
                full((E, 3 * E)),        # fused Wqkv (scale folded into q cols)
                full((1, 3 * E)),        # fused qkv bias
                full((E, E)),            # Wp
                full((1, E)),            # bp
            ],
            out_specs=pl.BlockSpec((1, N, E), lambda b: (b, 0, 0)),
            scratch_shapes=[pltpu.VMEM((N, E), jnp.float32)],   # head-output slab
        ),
        compiler_params=pltpu.CompilerParams(
            dimension_semantics=("parallel",),
            vmem_limit_bytes=64 * 1024 * 1024,
        ),
        cost_estimate=pl.CostEstimate(
            flops=int(flops),
            transcendentals=int(transcendentals),
            bytes_accessed=int(bytes_accessed)),
    )(x, params["gamma"], params["beta"], wqkv, params["bqkv"], wp, params["bp"])


def make_params(key, emb_size: int, num_heads: int):
    """Deterministic synthetic parameters, matching nn.Module shapes.

    PyTorch: qkv.weight (3E, E), qkv.bias (3E,), projection.weight (E, E),
             projection.bias (E,), ln.weight/bias (E,).
    We build the math-equivalent right-multiply matrices (x @ W + b),
    undo the einops '(h d qkv)' column interleave, fold the attention scale
    into the q columns/bias, and fuse [q | k | v] into one (E, 3E) weight.
    """
    E = emb_size
    H = num_heads
    d = E // H
    ks = jax.random.split(key, 4)
    s = 1.0 / math.sqrt(E)

    W_qkv = jax.random.uniform(ks[0], (E, 3 * E), jnp.float32, -s, s)  # x @ W_qkv
    b_qkv = jax.random.uniform(ks[1], (3 * E,), jnp.float32, -s, s)
    W_proj = jax.random.uniform(ks[2], (E, E), jnp.float32, -s, s)
    b_proj = jax.random.uniform(ks[3], (E,), jnp.float32, -s, s)
    gamma = jnp.ones((E,), jnp.float32)
    beta = jnp.zeros((E,), jnp.float32)

    # einops '(h d qkv)': output column j == (h, dd, qkv_idx) with
    # j = h*d*3 + dd*3 + qkv_idx.  Extract per-qkv weights in standard
    # head-major column order h*d + dd, then re-fuse as [q | k | v].
    scaling = d ** (-0.5)
    Wr = W_qkv.reshape(E, H, d, 3)
    br = b_qkv.reshape(H, d, 3)
    Wq, Wk, Wv = (Wr[..., i].reshape(E, E) for i in range(3))
    bq, bk, bv = (br[..., i].reshape(E) for i in range(3))
    W_fused = jnp.concatenate([Wq * scaling, Wk, Wv], axis=1)        # (E, 3E)
    b_fused = jnp.concatenate([bq * scaling, bk, bv]).reshape(1, 3 * E)

    kernel_params = dict(
        gamma=gamma.reshape(1, E), beta=beta.reshape(1, E),
        Wqkv=W_fused, bqkv=b_fused,
        Wp=W_proj, bp=b_proj.reshape(1, E),
    )
    raw_params = dict(W_qkv=W_qkv, b_qkv=b_qkv, W_proj=W_proj, b_proj=b_proj,
                      gamma=gamma, beta=beta)
    return kernel_params, raw_params


def ref_forward(x, raw, *, num_heads: int):
    """Pure-JAX reference reproducing the PyTorch forward exactly."""
    B, N, E = x.shape
    H = num_heads
    d = E // H
    scaling = d ** (-0.5)

    res = x
    mean = x.mean(-1, keepdims=True)
    var = ((x - mean) ** 2).mean(-1, keepdims=True)
    xn = (x - mean) / jnp.sqrt(var + LN_EPS) * raw["gamma"] + raw["beta"]

    qkv = xn @ raw["W_qkv"] + raw["b_qkv"]                 # (B, N, 3E)
    qkv = qkv.reshape(B, N, H, d, 3)
    qkv = jnp.transpose(qkv, (4, 0, 2, 1, 3))              # (3, B, H, N, d)
    q, k, v = qkv[0], qkv[1], qkv[2]
    energy = jnp.einsum('bhqd,bhkd->bhqk', q, k)
    att = jax.nn.softmax(energy * scaling, axis=-1)
    out = jnp.einsum('bhal,bhlv->bhav', att, v)
    out = jnp.transpose(out, (0, 2, 1, 3)).reshape(B, N, E)
    out = out @ raw["W_proj"] + raw["b_proj"]
    return out + res


if __name__ == "__main__":
    # Small but lane/sublane-dense: E multiple of 128, N multiple of 8.
    B, N, E, H = 2, 8, 128, 4   # batch, seq, emb_size, num_heads (head_dim=32)

    key = jax.random.PRNGKey(0)
    k_x, k_p = jax.random.split(key)
    x = jax.random.normal(k_x, (B, N, E), jnp.float32)
    kernel_params, raw_params = make_params(k_p, E, H)

    ref = ref_forward(x, raw_params, num_heads=H)

    # f32 MXU path: tight check against the pure-JAX reference.
    out_f32 = jax.block_until_ready(
        mha_forward(x, kernel_params, num_heads=H, compute_dtype=jnp.float32))
    assert out_f32.shape == (B, N, E)
    assert jnp.allclose(out_f32, ref, atol=2e-3, rtol=2e-3), \
        f"f32 max err {jnp.max(jnp.abs(out_f32 - ref))}"

    # bf16 MXU path (f32 accumulation, f32 LN/softmax): production default.
    out_bf16 = jax.block_until_ready(
        mha_forward(x, kernel_params, num_heads=H, compute_dtype=jnp.bfloat16))
    assert out_bf16.shape == (B, N, E)
    assert jnp.allclose(out_bf16, ref, atol=2e-2, rtol=2e-2), \
        f"bf16 max err {jnp.max(jnp.abs(out_bf16 - ref))}"

    print("KERNEL_OK")
</pallas_src>

<mosaic_0001>
module attributes {stable_mosaic.version = 11 : i64} {
  func.func @_mha_kernel(%arg0: i32, %arg1: memref<1x8x128xf32, #tpu.memory_space<vmem>>, %arg2: memref<1x128xf32, #tpu.memory_space<vmem>>, %arg3: memref<1x128xf32, #tpu.memory_space<vmem>>, %arg4: memref<128x384xf32, #tpu.memory_space<vmem>>, %arg5: memref<1x384xf32, #tpu.memory_space<vmem>>, %arg6: memref<128x128xf32, #tpu.memory_space<vmem>>, %arg7: memref<1x128xf32, #tpu.memory_space<vmem>>, %arg8: memref<1x8x128xf32, #tpu.memory_space<vmem>>, %arg9: memref<8x128xf32, #tpu.memory_space<vmem>>) attributes {dimension_semantics = [#tpu.dimension_semantics<parallel>], iteration_bounds = array<i64: 2>, scalar_prefetch = 0 : i64, scratch_operands = 1 : i64, tpu.core_type = #tpu.core_type<tc>, window_params = [{transform_indices = @transform_0, window_bounds = array<i64: 1, 8, 128>}, {pipeline_mode = #tpu.pipeline_mode<synchronous>, transform_indices = @transform_1, window_bounds = array<i64: 1, 128>}, {pipeline_mode = #tpu.pipeline_mode<synchronous>, transform_indices = @transform_2, window_bounds = array<i64: 1, 128>}, {pipeline_mode = #tpu.pipeline_mode<synchronous>, transform_indices = @transform_3, window_bounds = array<i64: 128, 384>}, {pipeline_mode = #tpu.pipeline_mode<synchronous>, transform_indices = @transform_4, window_bounds = array<i64: 1, 384>}, {pipeline_mode = #tpu.pipeline_mode<synchronous>, transform_indices = @transform_5, window_bounds = array<i64: 128, 128>}, {pipeline_mode = #tpu.pipeline_mode<synchronous>, transform_indices = @transform_6, window_bounds = array<i64: 1, 128>}, {transform_indices = @transform_7, window_bounds = array<i64: 1, 8, 128>}]} {
    %c0 = arith.constant 0 : index
    %c0_0 = arith.constant 0 : index
    %c0_1 = arith.constant 0 : index
    %0 = vector.load %arg1[%c0, %c0_0, %c0_1] : memref<1x8x128xf32, #tpu.memory_space<vmem>>, vector<1x8x128xf32>
    %1 = vector.shape_cast %0 : vector<1x8x128xf32> to vector<8x128xf32>
    %cst = arith.constant dense<0.000000e+00> : vector<8xf32>
    %2 = vector.multi_reduction <add>, %1, %cst [1] : vector<8x128xf32> to vector<8xf32>
    %3 = vector.shape_cast %2 : vector<8xf32> to vector<8x1xf32>
    %cst_2 = arith.constant 1.280000e+02 : f32
    %4 = vector.broadcast %cst_2 : f32 to vector<8x1xf32>
    %5 = arith.divf %3, %4 : vector<8x1xf32>
    %6 = vector.broadcast %5 : vector<8x1xf32> to vector<8x128xf32>
    %7 = arith.subf %1, %6 : vector<8x128xf32>
    %8 = arith.mulf %7, %7 : vector<8x128xf32>
    %cst_3 = arith.constant dense<0.000000e+00> : vector<8xf32>
    %9 = vector.multi_reduction <add>, %8, %cst_3 [1] : vector<8x128xf32> to vector<8xf32>
    %10 = vector.shape_cast %9 : vector<8xf32> to vector<8x1xf32>
    %cst_4 = arith.constant 1.280000e+02 : f32
    %11 = vector.broadcast %cst_4 : f32 to vector<8x1xf32>
    %12 = arith.divf %10, %11 : vector<8x1xf32>
    %13 = vector.broadcast %5 : vector<8x1xf32> to vector<8x128xf32>
    %14 = arith.subf %1, %13 : vector<8x128xf32>
    %cst_5 = arith.constant 9.99999974E-6 : f32
    %15 = vector.broadcast %cst_5 : f32 to vector<8x1xf32>
    %16 = arith.addf %12, %15 : vector<8x1xf32>
    %17 = math.rsqrt %16 : vector<8x1xf32>
    %18 = vector.broadcast %17 : vector<8x1xf32> to vector<8x128xf32>
    %19 = arith.mulf %14, %18 : vector<8x128xf32>
    %c0_6 = arith.constant 0 : index
    %c0_7 = arith.constant 0 : index
    %20 = vector.load %arg2[%c0_6, %c0_7] : memref<1x128xf32, #tpu.memory_space<vmem>>, vector<1x128xf32>
    %21 = vector.broadcast %20 : vector<1x128xf32> to vector<8x128xf32>
    %22 = arith.mulf %19, %21 : vector<8x128xf32>
    %c0_8 = arith.constant 0 : index
    %c0_9 = arith.constant 0 : index
    %23 = vector.load %arg3[%c0_8, %c0_9] : memref<1x128xf32, #tpu.memory_space<vmem>>, vector<1x128xf32>
    %24 = vector.broadcast %23 : vector<1x128xf32> to vector<8x128xf32>
    %25 = arith.addf %22, %24 : vector<8x128xf32>
    %c0_10 = arith.constant 0 : index
    %c0_11 = arith.constant 0 : index
    %26 = vector.load %arg4[%c0_10, %c0_11] : memref<128x384xf32, #tpu.memory_space<vmem>>, vector<128x384xf32>
    %cst_12 = arith.constant dense<0.000000e+00> : vector<8x384xf32>
    %27 = tpu.matmul %25, %26, %cst_12 {dimension_numbers = #tpu.dot_dimension_numbers<[1], [0], [0], [1], [0, 0, 1, 1], [], []>} : vector<8x128xf32>, vector<128x384xf32>, vector<8x384xf32> -> vector<8x384xf32>
    %c0_13 = arith.constant 0 : index
    %c0_14 = arith.constant 0 : index
    %28 = vector.load %arg5[%c0_13, %c0_14] : memref<1x384xf32, #tpu.memory_space<vmem>>, vector<1x384xf32>
    %29 = vector.broadcast %28 : vector<1x384xf32> to vector<8x384xf32>
    %30 = arith.addf %27, %29 : vector<8x384xf32>
    %31 = vector.extract_strided_slice %30 {offsets = [0, 0], sizes = [8, 128], strides = [1, 1]} : vector<8x384xf32> to vector<8x128xf32>
    %32 = vector.extract_strided_slice %30 {offsets = [0, 128], sizes = [8, 128], strides = [1, 1]} : vector<8x384xf32> to vector<8x128xf32>
    %33 = vector.extract_strided_slice %30 {offsets = [0, 256], sizes = [8, 128], strides = [1, 1]} : vector<8x384xf32> to vector<8x128xf32>
    %34 = vector.extract_strided_slice %31 {offsets = [0, 0], sizes = [8, 32], strides = [1, 1]} : vector<8x128xf32> to vector<8x32xf32>
    %35 = vector.extract_strided_slice %32 {offsets = [0, 0], sizes = [8, 32], strides = [1, 1]} : vector<8x128xf32> to vector<8x32xf32>
    %36 = vector.extract_strided_slice %33 {offsets = [0, 0], sizes = [8, 32], strides = [1, 1]} : vector<8x128xf32> to vector<8x32xf32>
    %cst_15 = arith.constant dense<0.000000e+00> : vector<8x8xf32>
    %37 = tpu.matmul %34, %35, %cst_15 {dimension_numbers = #tpu.dot_dimension_numbers<[1], [1], [0], [0], [0, 0, 1, 0], [], []>} : vector<8x32xf32>, vector<8x32xf32>, vector<8x8xf32> -> vector<8x8xf32>
    %cst_16 = arith.constant dense<0xFF800000> : vector<8xf32>
    %38 = vector.multi_reduction <maximumf>, %37, %cst_16 [1] : vector<8x8xf32> to vector<8xf32>
    %39 = vector.shape_cast %38 : vector<8xf32> to vector<8x1xf32>
    %40 = vector.broadcast %39 : vector<8x1xf32> to vector<8x8xf32>
    %41 = arith.subf %37, %40 : vector<8x8xf32>
    %42 = math.exp %41 : vector<8x8xf32>
    %cst_17 = arith.constant dense<0.000000e+00> : vector<8xf32>
    %43 = vector.multi_reduction <add>, %42, %cst_17 [1] : vector<8x8xf32> to vector<8xf32>
    %44 = vector.shape_cast %43 : vector<8xf32> to vector<8x1xf32>
    %45 = vector.broadcast %44 : vector<8x1xf32> to vector<8x8xf32>
    %46 = arith.divf %42, %45 : vector<8x8xf32>
    %cst_18 = arith.constant dense<0.000000e+00> : vector<8x32xf32>
    %47 = tpu.matmul %46, %36, %cst_18 {dimension_numbers = #tpu.dot_dimension_numbers<[1], [0], [0], [1], [0, 0, 1, 1], [], []>} : vector<8x8xf32>, vector<8x32xf32>, vector<8x32xf32> -> vector<8x32xf32>
    %c0_19 = arith.constant 0 : index
    %c0_20 = arith.constant 0 : index
    %48 = vector.load %arg9[%c0_19, %c0_20] : memref<8x128xf32, #tpu.memory_space<vmem>>, vector<8x32xf32>
    tpu.vector_store %arg9[%c0_19, %c0_20], %47 {strides = array<i32>} : memref<8x128xf32, #tpu.memory_space<vmem>>, vector<8x32xf32>,
    %49 = vector.extract_strided_slice %31 {offsets = [0, 32], sizes = [8, 32], strides = [1, 1]} : vector<8x128xf32> to vector<8x32xf32>
    %50 = vector.extract_strided_slice %32 {offsets = [0, 32], sizes = [8, 32], strides = [1, 1]} : vector<8x128xf32> to vector<8x32xf32>
    %51 = vector.extract_strided_slice %33 {offsets = [0, 32], sizes = [8, 32], strides = [1, 1]} : vector<8x128xf32> to vector<8x32xf32>
    %cst_21 = arith.constant dense<0.000000e+00> : vector<8x8xf32>
    %52 = tpu.matmul %49, %50, %cst_21 {dimension_numbers = #tpu.dot_dimension_numbers<[1], [1], [0], [0], [0, 0, 1, 0], [], []>} : vector<8x32xf32>, vector<8x32xf32>, vector<8x8xf32> -> vector<8x8xf32>
    %cst_22 = arith.constant dense<0xFF800000> : vector<8xf32>
    %53 = vector.multi_reduction <maximumf>, %52, %cst_22 [1] : vector<8x8xf32> to vector<8xf32>
    %54 = vector.shape_cast %53 : vector<8xf32> to vector<8x1xf32>
    %55 = vector.broadcast %54 : vector<8x1xf32> to vector<8x8xf32>
    %56 = arith.subf %52, %55 : vector<8x8xf32>
    %57 = math.exp %56 : vector<8x8xf32>
    %cst_23 = arith.constant dense<0.000000e+00> : vector<8xf32>
    %58 = vector.multi_reduction <add>, %57, %cst_23 [1] : vector<8x8xf32> to vector<8xf32>
    %59 = vector.shape_cast %58 : vector<8xf32> to vector<8x1xf32>
    %60 = vector.broadcast %59 : vector<8x1xf32> to vector<8x8xf32>
    %61 = arith.divf %57, %60 : vector<8x8xf32>
    %cst_24 = arith.constant dense<0.000000e+00> : vector<8x32xf32>
    %62 = tpu.matmul %61, %51, %cst_24 {dimension_numbers = #tpu.dot_dimension_numbers<[1], [0], [0], [1], [0, 0, 1, 1], [], []>} : vector<8x8xf32>, vector<8x32xf32>, vector<8x32xf32> -> vector<8x32xf32>
    %c0_25 = arith.constant 0 : index
    %c32 = arith.constant 32 : index
    %63 = vector.load %arg9[%c0_25, %c32] : memref<8x128xf32, #tpu.memory_space<vmem>>, vector<8x32xf32>
    tpu.vector_store %arg9[%c0_25, %c32], %62 {strides = array<i32>} : memref<8x128xf32, #tpu.memory_space<vmem>>, vector<8x32xf32>,
    %64 = vector.extract_strided_slice %31 {offsets = [0, 64], sizes = [8, 32], strides = [1, 1]} : vector<8x128xf32> to vector<8x32xf32>
    %65 = vector.extract_strided_slice %32 {offsets = [0, 64], sizes = [8, 32], strides = [1, 1]} : vector<8x128xf32> to vector<8x32xf32>
    %66 = vector.extract_strided_slice %33 {offsets = [0, 64], sizes = [8, 32], strides = [1, 1]} : vector<8x128xf32> to vector<8x32xf32>
    %cst_26 = arith.constant dense<0.000000e+00> : vector<8x8xf32>
    %67 = tpu.matmul %64, %65, %cst_26 {dimension_numbers = #tpu.dot_dimension_numbers<[1], [1], [0], [0], [0, 0, 1, 0], [], []>} : vector<8x32xf32>, vector<8x32xf32>, vector<8x8xf32> -> vector<8x8xf32>
    %cst_27 = arith.constant dense<0xFF800000> : vector<8xf32>
    %68 = vector.multi_reduction <maximumf>, %67, %cst_27 [1] : vector<8x8xf32> to vector<8xf32>
    %69 = vector.shape_cast %68 : vector<8xf32> to vector<8x1xf32>
    %70 = vector.broadcast %69 : vector<8x1xf32> to vector<8x8xf32>
    %71 = arith.subf %67, %70 : vector<8x8xf32>
    %72 = math.exp %71 : vector<8x8xf32>
    %cst_28 = arith.constant dense<0.000000e+00> : vector<8xf32>
    %73 = vector.multi_reduction <add>, %72, %cst_28 [1] : vector<8x8xf32> to vector<8xf32>
    %74 = vector.shape_cast %73 : vector<8xf32> to vector<8x1xf32>
    %75 = vector.broadcast %74 : vector<8x1xf32> to vector<8x8xf32>
    %76 = arith.divf %72, %75 : vector<8x8xf32>
    %cst_29 = arith.constant dense<0.000000e+00> : vector<8x32xf32>
    %77 = tpu.matmul %76, %66, %cst_29 {dimension_numbers = #tpu.dot_dimension_numbers<[1], [0], [0], [1], [0, 0, 1, 1], [], []>} : vector<8x8xf32>, vector<8x32xf32>, vector<8x32xf32> -> vector<8x32xf32>
    %c0_30 = arith.constant 0 : index
    %c64 = arith.constant 64 : index
    %78 = vector.load %arg9[%c0_30, %c64] : memref<8x128xf32, #tpu.memory_space<vmem>>, vector<8x32xf32>
    tpu.vector_store %arg9[%c0_30, %c64], %77 {strides = array<i32>} : memref<8x128xf32, #tpu.memory_space<vmem>>, vector<8x32xf32>,
    %79 = vector.extract_strided_slice %31 {offsets = [0, 96], sizes = [8, 32], strides = [1, 1]} : vector<8x128xf32> to vector<8x32xf32>
    %80 = vector.extract_strided_slice %32 {offsets = [0, 96], sizes = [8, 32], strides = [1, 1]} : vector<8x128xf32> to vector<8x32xf32>
    %81 = vector.extract_strided_slice %33 {offsets = [0, 96], sizes = [8, 32], strides = [1, 1]} : vector<8x128xf32> to vector<8x32xf32>
    %cst_31 = arith.constant dense<0.000000e+00> : vector<8x8xf32>
    %82 = tpu.matmul %79, %80, %cst_31 {dimension_numbers = #tpu.dot_dimension_numbers<[1], [1], [0], [0], [0, 0, 1, 0], [], []>} : vector<8x32xf32>, vector<8x32xf32>, vector<8x8xf32> -> vector<8x8xf32>
    %cst_32 = arith.constant dense<0xFF800000> : vector<8xf32>
    %83 = vector.multi_reduction <maximumf>, %82, %cst_32 [1] : vector<8x8xf32> to vector<8xf32>
    %84 = vector.shape_cast %83 : vector<8xf32> to vector<8x1xf32>
    %85 = vector.broadcast %84 : vector<8x1xf32> to vector<8x8xf32>
    %86 = arith.subf %82, %85 : vector<8x8xf32>
    %87 = math.exp %86 : vector<8x8xf32>
    %cst_33 = arith.constant dense<0.000000e+00> : vector<8xf32>
    %88 = vector.multi_reduction <add>, %87, %cst_33 [1] : vector<8x8xf32> to vector<8xf32>
    %89 = vector.shape_cast %88 : vector<8xf32> to vector<8x1xf32>
    %90 = vector.broadcast %89 : vector<8x1xf32> to vector<8x8xf32>
    %91 = arith.divf %87, %90 : vector<8x8xf32>
    %cst_34 = arith.constant dense<0.000000e+00> : vector<8x32xf32>
    %92 = tpu.matmul %91, %81, %cst_34 {dimension_numbers = #tpu.dot_dimension_numbers<[1], [0], [0], [1], [0, 0, 1, 1], [], []>} : vector<8x8xf32>, vector<8x32xf32>, vector<8x32xf32> -> vector<8x32xf32>
    %c0_35 = arith.constant 0 : index
    %c96 = arith.constant 96 : index
    %93 = vector.load %arg9[%c0_35, %c96] : memref<8x128xf32, #tpu.memory_space<vmem>>, vector<8x32xf32>
    tpu.vector_store %arg9[%c0_35, %c96], %92 {strides = array<i32>} : memref<8x128xf32, #tpu.memory_space<vmem>>, vector<8x32xf32>,
    %c0_36 = arith.constant 0 : index
    %c0_37 = arith.constant 0 : index
    %94 = vector.load %arg9[%c0_36, %c0_37] : memref<8x128xf32, #tpu.memory_space<vmem>>, vector<8x128xf32>
    %c0_38 = arith.constant 0 : index
    %c0_39 = arith.constant 0 : index
    %95 = vector.load %arg6[%c0_38, %c0_39] : memref<128x128xf32, #tpu.memory_space<vmem>>, vector<128x128xf32>
    %cst_40 = arith.constant dense<0.000000e+00> : vector<8x128xf32>
    %96 = tpu.matmul %94, %95, %cst_40 {dimension_numbers = #tpu.dot_dimension_numbers<[1], [0], [0], [1], [0, 0, 1, 1], [], []>} : vector<8x128xf32>, vector<128x128xf32>, vector<8x128xf32> -> vector<8x128xf32>
    %c0_41 = arith.constant 0 : index
    %c0_42 = arith.constant 0 : index
    %97 = vector.load %arg7[%c0_41, %c0_42] : memref<1x128xf32, #tpu.memory_space<vmem>>, vector<1x128xf32>
    %98 = vector.broadcast %97 : vector<1x128xf32> to vector<8x128xf32>
    %99 = arith.addf %96, %98 : vector<8x128xf32>
    %100 = arith.addf %99, %1 : vector<8x128xf32>
    %c0_43 = arith.constant 0 : index
    %c0_44 = arith.constant 0 : index
    %c0_45 = arith.constant 0 : index
    %101 = vector.load %arg8[%c0_43, %c0_44, %c0_45] : memref<1x8x128xf32, #tpu.memory_space<vmem>>, vector<1x8x128xf32>
    %102 = vector.shape_cast %101 : vector<1x8x128xf32> to vector<8x128xf32>
    %103 = vector.shape_cast %100 : vector<8x128xf32> to vector<1x8x128xf32>
    tpu.vector_store %arg8[%c0_43, %c0_44, %c0_45], %103 {strides = array<i32>} : memref<1x8x128xf32, #tpu.memory_space<vmem>>, vector<1x8x128xf32>,
    return
  }
  func.func @transform_0(%arg0: i32) -> (i32, i32, i32) {
    %c0_i32 = arith.constant 0 : i32
    %c0_i32_0 = arith.constant 0 : i32
    %c0_i32_1 = arith.constant 0 : i32
    return %arg0, %c0_i32, %c0_i32_0 : i32, i32, i32
  }
  func.func @transform_1(%arg0: i32) -> (i32, i32) {
    %c0_i32 = arith.constant 0 : i32
    %c0_i32_0 = arith.constant 0 : i32
    %c0_i32_1 = arith.constant 0 : i32
    return %c0_i32, %c0_i32_0 : i32, i32
  }
  func.func @transform_2(%arg0: i32) -> (i32, i32) {
    %c0_i32 = arith.constant 0 : i32
    %c0_i32_0 = arith.constant 0 : i32
    %c0_i32_1 = arith.constant 0 : i32
    return %c0_i32, %c0_i32_0 : i32, i32
  }
  func.func @transform_3(%arg0: i32) -> (i32, i32) {
    %c0_i32 = arith.constant 0 : i32
    %c0_i32_0 = arith.constant 0 : i32
    %c0_i32_1 = arith.constant 0 : i32
    return %c0_i32, %c0_i32_0 : i32, i32
  }
  func.func @transform_4(%arg0: i32) -> (i32, i32) {
    %c0_i32 = arith.constant 0 : i32
    %c0_i32_0 = arith.constant 0 : i32
    %c0_i32_1 = arith.constant 0 : i32
    return %c0_i32, %c0_i32_0 : i32, i32
  }
  func.func @transform_5(%arg0: i32) -> (i32, i32) {
    %c0_i32 = arith.constant 0 : i32
    %c0_i32_0 = arith.constant 0 : i32
    %c0_i32_1 = arith.constant 0 : i32
    return %c0_i32, %c0_i32_0 : i32, i32
  }
  func.func @transform_6(%arg0: i32) -> (i32, i32) {
    %c0_i32 = arith.constant 0 : i32
    %c0_i32_0 = arith.constant 0 : i32
    %c0_i32_1 = arith.constant 0 : i32
    return %c0_i32, %c0_i32_0 : i32, i32
  }
  func.func @transform_7(%arg0: i32) -> (i32, i32, i32) {
    %c0_i32 = arith.constant 0 : i32
    %c0_i32_0 = arith.constant 0 : i32
    %c0_i32_1 = arith.constant 0 : i32
    return %arg0, %c0_i32, %c0_i32_0 : i32, i32, i32
  }
}

</mosaic_0001>

<bundles_post_ra>
// kernel: tpu_custom_call.1
= control target key start
LH: loop header
LB: loop body
LE: loop exit
PB: predicated region body
PF: predicated region fallthrough
CT: control target
= control target key end

     0   :  { %s1672_s0 = inlined_call_operand.hbm [shape: f32[2,8,128], index: 0, kind: input, shape index: {}]   ;;  %s1673_s1 = inlined_call_operand.hbm [shape: f32[1,128], index: 1, kind: input, shape index: {}]   ;;  %s1674_s2 = inlined_call_operand.hbm [shape: f32[1,128], index: 2, kind: input, shape index: {}]   ;;  %s1675_s3 = inlined_call_operand.hbm [shape: f32[128,384], index: 3, kind: input, shape index: {}]   ;;  %s1676_s4 = inlined_call_operand.vmem [shape: f32[1,384], index: 4, kind: input, shape index: {}]   ;;  %s1677_s5 = inlined_call_operand.hbm [shape: f32[128,128], index: 5, kind: input, shape index: {}]   ;;  %s1678_s6 = inlined_call_operand.vmem [shape: f32[1,128], index: 6, kind: input, shape index: {}]   ;;  %s1679_s7 = inlined_call_operand.hbm [shape: f32[2,8,128], index: 7, kind: output, shape index: {}]  }
   0x1   :  { %1680 = sst [smem:[#allocation17_spill]] %s1673_s1 }
   0x2   :  { %1681 = sst [smem:[#allocation18_spill]] %s1674_s2 }
   0x3   :  { %12 = vsyncpa [#allocation4], 0 }
   0x4   :  { %14 = vsyncpa [#allocation4 + $0x1], 0 }
   0x5   :  { %15 = vsyncpa [#allocation7], 0 }
   0x6   :  { %16 = vsyncpa [#allocation10], 0 }
   0x7   :  { %17 = vsyncpa [#allocation5], 0 }
   0x8   :  { %19 = vsyncpa [#allocation5 + $0x1], 0  ;;  %s1436_s24 = smov 0   ;;  %s1438_s25 = smov 0  }
   0x9   :  { %s1440_s26 = smov 0   ;;  %s1442_s27 = smov 0  }
   0xa LB: > { %s1682_s1 = sld [smem:[#allocation17_spill]]  ;;  %s1460_s8 = sadd.s32 4294967295, %s1382_s27   ;;  %s1382_s27 = sphi %s1442_s27, %s1695_s27   ;;  %s1378_s26 = sphi %s1440_s26, %s1694_s26   ;;  %s1374_s25 = sphi %s1438_s25, %s1693_s25   ;;  %s1370_s24 = sphi %s1436_s24, %s1692_s24  }
   0xb   : > { %p1009_p0 = scmp.ge.s32.totalorder %s1382_s27, 1  ;;  %p46_p1 = scmp.eq.s32.totalorder %s1460_s8, 0 }
   0xc   : > { %p208_p2 = scmp.lt.s32.totalorder %s1382_s27, 3  ;;  %s1384_s10 = smov [#allocation6]  }
   0xd   : > { %s222_s11 = sshll.u32 %s1384_s10, 4  ;;  %s243_s14 = sshll.u32 %s1675_s3, 4  ;;  %s223_s11 = int_to_ptr.vmem [resolvable:$true] %s222_s11  ;;  %s244_s14 = int_to_ptr.hbm [resolvable:$true] %s243_s14 }
   0xe   : > { %p1465_p3 = pnand %p1009_p0, %p208_p2  ;;  %s1385_s16 = smov [#allocation9]  }
   0xf   : > { %s245_s17 = sshll.u32 %s1385_s16, 4  ;;  %s1386_s18 = smov 384   ;;  %s246_s17 = int_to_ptr.vmem [resolvable:$true] %s245_s17 }
  0x10   : > { %s220_s30 = sshll.u32 %s1682_s1, 4  ;;  %p1060_p5 = pneg %p1465_p3  ;;  %s221_s30 = int_to_ptr.hbm [resolvable:$true] %s220_s30 }
  0x11   : > { %s1387_s19 = smov 24   ;;  %s1685_s2 = sld [smem:[#allocation18_spill]] }
  0x12   : > { %p1477_p6 = pnand %p1060_p5, %p46_p1  ;;  %s1388_s23 = smov [#allocation8]  }
  0x13   : > { %s234_s28 = sshll.u32 %s1388_s23, 4  ;;  %s260_s10 = sshll.u32 %s1677_s5, 4  ;;  %s235_s28 = int_to_ptr.vmem [resolvable:$true] %s234_s28  ;;  %s261_s10 = int_to_ptr.hbm [resolvable:$true] %s260_s10 }
  0x14   : > { %1063 = dma.hbm_to_vmem [thread:$0]  (!%p1477_p6), %s221_s30, 16, %s223_s11, [#allocation7]  }
  0x15   : > { %1069 = dma.hbm_to_vmem [thread:$0]  (!%p1477_p6), %s244_s14, 6144, %s246_s17, [#allocation10], %s1386_s18, %s1386_s18, %s1387_s19  }
  0x16   : > { %s1389_s11 = smov [#allocation11]   ;;  %s1390_s13 = smov 128  }
  0x17   : > { %s232_s22 = sshll.u32 %s1685_s2, 4  ;;  %s262_s12 = sshll.u32 %s1389_s11, 4  ;;  %s233_s22 = int_to_ptr.hbm [resolvable:$true] %s232_s22  ;;  %s263_s12 = int_to_ptr.vmem [resolvable:$true] %s262_s12 }
  0x18   : > { %1066 = dma.hbm_to_vmem [thread:$0]  (!%p1477_p6), %s233_s22, 16, %s235_s28, [#allocation7]  }
  0x19   : > { %s1391_s14 = smov 8   ;;  %s1008_s16 = sadd.s32 4294967294, %s1382_s27  }
  0x1a   : > { %1072 = dma.hbm_to_vmem [thread:$0]  (!%p1477_p6), %s261_s10, 2048, %s263_s12, [#allocation10], %s1390_s13, %s1390_s13, %s1391_s14  }
  0x1b   : > { %s1497_s17 = sadd.s32 1, %s1382_s27   ;;  %s32_s19 = sadd.s32 1, %s1378_s26 }
  0x1c   : > { %s29_s18 = ssub.s32 %s1382_s27, %s1497_s17  ;;  %p39_p8 = scmp.ne.s32.totalorder %s1378_s26, %s1374_s25 }
  0x1d   : > { %p30_p7 = scmp.eq.s32.totalorder %s29_s18, 0  ;;  %p40_p9 = scmp.eq.s32.totalorder %s1382_s27, 0 }
  0x1e   : > { %p45_p10 = scmp.ne.s32.totalorder %s1374_s25, %s1370_s24  ;;  %p195_p13 = scmp.eq.s32.totalorder %s1460_s8, 1 }
  0x1f   : > { %s1508_s20 = scalar_select %p30_p7, %s1378_s26, %s32_s19  }
  0x20   : > { %p1510_p11 = por %p40_p9, %p39_p8  ;;  %p1516_p12 = por %p46_p1, %p45_p10 }
  0x21   : > { %p201_p0 = scmp.eq.s32.totalorder %s1008_s16, 1  ;;  %p1085_p2 = scmp.lt.s32.totalorder %s1382_s27, 2 }
  0x22   : > { %s279_s22 = sand.u32 1, %s1378_s26   ;;  %p1523_p5 = por %p195_p13, %p39_p8 }
  0x23   : > { %p1527_p6 = por %p201_p0, %p45_p10  ;;  %s1015_s29 = sshll.u32 %s279_s22, 3 }
  0x24   : > { %s1016_s30 = sshll.u32 %s1382_s27, 3  ;;  %s283_s13 = scalar_lea.vmem [#allocation3], %s1015_s29 }
  0x25   : > { %s287_s12 = scalar_lea.hbm %s1672_s0, %s1016_s30  ;;  %s291_s14 = sshll.u32 %s283_s13, 4  ;;  %s292_s14 = int_to_ptr.vmem [resolvable:$true] %s291_s14 }
  0x26   : > { %s289_s18 = sshll.u32 %s287_s12, 4  ;;  %p1537_p7 = pnand %p1085_p2, %p1510_p11  ;;  %s290_s18 = int_to_ptr.hbm [resolvable:$true] %s289_s18 }
  0x27   : > { %s280_s19 = scalar_lea.sflag [#allocation4], %s279_s22  ;;  %s1278_s1 = sshra.s32 %s290_s18, 4  ;;  %s1279_s1 = int_to_ptr.hbm [resolvable:$true] %s1278_s1 }
  0x28   : > { %s1280_s2 = scalar_lea.hbm %s1279_s1, 8  ;;  %p1282_p9 = pneg %p1537_p7 }
  0x29   : > { %p1281_p8 = scmp.ne.s32.totalorder %s1279_s1, %s1280_s2  ;;  %s1285_s10 = scalar_lea.hbm %s1672_s0, 16 }
  0x2a   : > { %p1286_p11 = scmp.lt.s32.totalorder %s1279_s1, %s1672_s0  ;;  %p1287_p0 = scmp.lt.s32.totalorder %s1285_s10, %s1280_s2 }
  0x2b   : > { %p1283_p10 = pnand %p1282_p9, %p1281_p8 }
  0x2c   : > { %p1288_p2 = por %p1287_p0, %p1286_p11 }
  0x2d   : > { %p1284_p13 = pneg %p1283_p10 }
  0x2f   : > { %p1289_p4 = pnand %p1288_p2, %p1284_p13 }
  0x31   : > { %1292 = shalt.err (!%p1289_p4)
}
  0x32   : > { %1076 = dma.hbm_to_vmem [thread:$0]  (!%p1537_p7), %s290_s18, 128, %s292_s14, %s280_s19  }
  0x33   : > { %300 = sbr.rel (%p1465_p3) target bundleno = 1762 (0x6e2), region = 48  ;;  %s1554_s22 = sand.u32 (!%p1465_p3), 1, %s1374_s25  }
  0x34   : > { %s1018_s12 = sshll.u32 (!%p1465_p3), %s1554_s22, 3  ;;  %s303_s13 = scalar_lea.sflag (!%p1465_p3), [#allocation4], %s1554_s22 }
  0x35   : > { %s306_s1 = scalar_lea.vmem (!%p1465_p3), [#allocation3], %s1018_s12 }
  0x38   : > { %1353 = dma.done.wait (%p1516_p12), %s303_s13, 128  }
  0x39   : > { %1355 = vsyncadd (%p1516_p12), %s303_s13, 4294967168 }
  0x3a   : > { %1357 = dma.done.wait (%p46_p1), [#allocation7], 32  }
  0x3b   : > { %1359 = vsyncadd (%p46_p1), [#allocation7], 4294967264 }
  0x3c   : > { %1361 = dma.done.wait (%p46_p1), [#allocation10], 8192  }
  0x3d   : > { %1363 = vsyncadd (%p46_p1), [#allocation10], 4294959104  ;;  %v1572_v0 = vld [vmem:[%s306_s1] sm:$0xff]  ;;  %v1392_v1 = vmov 128.0   ;;  %v440_v7 = vld [vmem:[#allocation9 + $0x160] sm:$0xff]  ;;  %vm512_vm4 = vcmask 261120  }
  0x3e   : > { %359 = vadd.xlane.f32.xlu0 %v1572_v0  ;;  %1138 = vrcp.f32 %v1392_v1  ;;  %v441_v2 = vld [vmem:[#allocation9 + $0x168] sm:$0xff]  ;;  %v442_v3 = vld [vmem:[#allocation9 + $0x170] sm:$0xff]  ;;  %v443_v4 = vld [vmem:[#allocation9 + $0x178] sm:$0xff]  ;;  %s1393_s15 = smov 96   ;;  %s1394_s14 = smov 64   ;;  %vm539_vm5 = vcmask 64512  }
  0x3f   : > { %452 = vmatpush.msra.mxu0 %v441_v2  ;;  %472 = vmatpush.msra.mxu1 %v442_v3  ;;  %v438_v5 = vld [vmem:[#allocation9 + $0x150] sm:$0xff]  ;;  %v439_v6 = vld [vmem:[#allocation9 + $0x158] sm:$0xff]  ;;  %v436_v19 = vld [vmem:[#allocation9 + $0x140] sm:$0xff]  ;;  %s1395_s18 = smov 32   ;;  %s1037_s16 = sshll.u32 %s1460_s8, 3 }
  0x40   : > { %492 = vmatpush.msra.mxu2 %v443_v4  ;;  %v435_v18 = vld [vmem:[#allocation9 + $0x138] sm:$0xff]  ;;  %v437_v20 = vld [vmem:[#allocation9 + $0x148] sm:$0xff]  ;;  %v432_v21 = vld [vmem:[#allocation9 + $0x120] sm:$0xff]  ;;  %s895_s11 = scalar_lea.hbm %s1679_s7, %s1037_s16  ;;  %s357_s21 = scalar_lea.vmem [#allocation12], %s1018_s12 }
  0x41   : > { %453 = vmatpush.msra.mxu0 %v438_v5  ;;  %473 = vmatpush.msra.mxu1 %v439_v6  ;;  %v433_v22 = vld [vmem:[#allocation9 + $0x128] sm:$0xff]  ;;  %v434_v23 = vld [vmem:[#allocation9 + $0x130] sm:$0xff]  ;;  %v431_v26 = vld [vmem:[#allocation9 + $0x118] sm:$0xff]  ;;  %s897_s13 = sshll.u32 %s357_s21, 4  ;;  %s899_s1 = sshll.u32 %s895_s11, 4  ;;  %s898_s13 = int_to_ptr.vmem [resolvable:$true] %s897_s13  ;;  %s900_s1 = int_to_ptr.hbm [resolvable:$true] %s899_s1 }
  0x42   : > { %493 = vmatpush.msra.mxu2 %v440_v7  ;;  %v429_v24 = vld [vmem:[#allocation9 + $0x108] sm:$0xff]  ;;  %v430_v25 = vld [vmem:[#allocation9 + $0x110] sm:$0xff]  ;;  %v427_v28 = vld [vmem:[#allocation9 + $0xf8] sm:$0xff]  ;;  %s885_s8 = scalar_lea.sflag [#allocation5], %s1554_s22  ;;  %s1322_s2 = sshra.s32 %s900_s1, 4  ;;  %s1323_s2 = int_to_ptr.hbm [resolvable:$true] %s1322_s2 }
  0x43   : > { %454 = vmatpush.msra.mxu0 %v435_v18  ;;  %474 = vmatpush.msra.mxu1 %v436_v19  ;;  %v426_v27 = vld [vmem:[#allocation9 + $0xf0] sm:$0xff]  ;;  %v428_v29 = vld [vmem:[#allocation9 + $0x100] sm:$0xff]  ;;  %v423_v30 = vld [vmem:[#allocation9 + $0xd8] sm:$0xff]  ;;  %s1324_s9 = scalar_lea.hbm %s1323_s2, 8  ;;  %s1328_s12 = scalar_lea.hbm %s1679_s7, 16 }
  0x44   : > { %v1139_v8 = vpop.eup %1138  ;;  %494 = vmatpush.msra.mxu2 %v437_v20  ;;  %v424_v31 = vld [vmem:[#allocation9 + $0xe0] sm:$0xff]  ;;  %v425_v32 = vld [vmem:[#allocation9 + $0xe8] sm:$0xff]  ;;  %v422_v35 = vld [vmem:[#allocation9 + $0xd0] sm:$0xff]  ;;  %p1325_p1 = scmp.ne.s32.totalorder %s1323_s2, %s1324_s9  ;;  %p1329_p12 = scmp.lt.s32.totalorder %s1323_s2, %s1679_s7 }
  0x45   : > { %v362_v9 = vmul.f32 128.0, %v1139_v8  ;;  %vm366_vm0 = vweird.f32 %v1139_v8  ;;  %455 = vmatpush.msra.mxu0 %v432_v21  ;;  %475 = vmatpush.msra.mxu1 %v433_v22  ;;  %v420_v33 = vld [vmem:[#allocation9 + $0xc0] sm:$0xff]  ;;  %v421_v34 = vld [vmem:[#allocation9 + $0xc8] sm:$0xff]  ;;  %v418_v37 = vld [vmem:[#allocation9 + $0xb0] sm:$0xff]  ;;  %p1330_p7 = scmp.lt.s32.totalorder %s1328_s12, %s1324_s9 }
  0x46   : > { %495 = vmatpush.msra.mxu2 %v434_v23  ;;  %v417_v36 = vld [vmem:[#allocation9 + $0xa8] sm:$0xff]  ;;  %v419_v38 = vld [vmem:[#allocation9 + $0xb8] sm:$0xff]  ;;  %v414_v39 = vld [vmem:[#allocation9 + $0x90] sm:$0xff]  ;;  %p1326_p3 = pnand %p1325_p1, %p1523_p5 }
  0x47   : > { %v363_v10 = vsub.f32 1.0, %v362_v9  ;;  %456 = vmatpush.msra.mxu0 %v429_v24  ;;  %476 = vmatpush.msra.mxu1 %v430_v25  ;;  %v415_v40 = vld [vmem:[#allocation9 + $0x98] sm:$0xff]  ;;  %v416_v41 = vld [vmem:[#allocation9 + $0xa0] sm:$0xff]  ;;  %v413_v44 = vld [vmem:[#allocation9 + $0x88] sm:$0xff]  ;;  %p1331_p8 = por %p1330_p7, %p1329_p12 }
  0x48   : > { %496 = vmatpush.msra.mxu2 %v431_v26  ;;  %v411_v42 = vld [vmem:[#allocation9 + $0x78] sm:$0xff]  ;;  %v412_v43 = vld [vmem:[#allocation9 + $0x80] sm:$0xff]  ;;  %v409_v46 = vld [vmem:[#allocation9 + $0x68] sm:$0xff]  ;;  %p1327_p4 = pneg %p1326_p3 }
  0x49   : > { %v364_v11 = vmul.f32 %v1139_v8, %v363_v10  ;;  %457 = vmatpush.msra.mxu0 %v426_v27  ;;  %477 = vmatpush.msra.mxu1 %v427_v28  ;;  %v408_v45 = vld [vmem:[#allocation9 + $0x60] sm:$0xff]  ;;  %v410_v47 = vld [vmem:[#allocation9 + $0x70] sm:$0xff]  ;;  %v405_v48 = vld [vmem:[#allocation9 + $0x48] sm:$0xff] }
  0x4a   : > { %497 = vmatpush.msra.mxu2 %v428_v29  ;;  %v406_v49 = vld [vmem:[#allocation9 + $0x50] sm:$0xff]  ;;  %v407_v50 = vld [vmem:[#allocation9 + $0x58] sm:$0xff]  ;;  %v404_v53 = vld [vmem:[#allocation9 + $0x40] sm:$0xff]  ;;  %p1332_p9 = pnand %p1331_p8, %p1327_p4 }
  0x4b   : > { %v365_v12 = vadd.f32 %v1139_v8, %v364_v11  ;;  %458 = vmatpush.msra.mxu0 %v423_v30  ;;  %478 = vmatpush.msra.mxu1 %v424_v31  ;;  %v402_v51 = vld [vmem:[#allocation9 + $0x30] sm:$0xff]  ;;  %v403_v52 = vld [vmem:[#allocation9 + $0x38] sm:$0xff]  ;;  %v400_v55 = vld [vmem:[#allocation9 + $0x20] sm:$0xff] }
  0x4c   : > { %498 = vmatpush.msra.mxu2 %v425_v32  ;;  %v399_v54 = vld [vmem:[#allocation9 + $0x18] sm:$0xff]  ;;  %v401_v56 = vld [vmem:[#allocation9 + $0x28] sm:$0xff]  ;;  %v396_v57 = vld [vmem:[#allocation9] sm:$0xff] }
  0x4d   : > { %v1575_v13 = vsel %vm366_vm0, %v1139_v8, %v365_v12  ;;  %459 = vmatpush.msra.mxu0 %v420_v33  ;;  %479 = vmatpush.msra.mxu1 %v421_v34  ;;  %v397_v58 = vld [vmem:[#allocation9 + $0x8] sm:$0xff]  ;;  %v398_v59 = vld [vmem:[#allocation9 + $0x10] sm:$0xff]  ;;  %v1135_v6 = vld [vmem:[#allocation6] ss:$0 sm:$0xff] }
  0x4e   : > { %499 = vmatpush.msra.mxu2 %v422_v35  ;;  %v1136_v9 = vld [vmem:[#allocation8] ss:$0 sm:$0xff]  ;;  %v444_v12 = vld [vmem:[%s1676_s4] sm:$0x7] }
  0x4f   : > { %460 = vmatpush.msra.mxu0 %v417_v36  ;;  %480 = vmatpush.msra.mxu1 %v418_v37  ;;  %v448_v19 = vperm.slane %v444_v12, 2 }
  0x50   : > { %500 = vmatpush.msra.mxu2 %v419_v38 }
  0x51   : > { %461 = vmatpush.msra.mxu0 %v414_v39  ;;  %481 = vmatpush.msra.mxu1 %v415_v40 }
  0x52   : > { %501 = vmatpush.msra.mxu2 %v416_v41 }
  0x53   : > { %462 = vmatpush.msra.mxu0 %v411_v42  ;;  %482 = vmatpush.msra.mxu1 %v412_v43 }
  0x54   : > { %502 = vmatpush.msra.mxu2 %v413_v44 }
  0x55   : > { %463 = vmatpush.msra.mxu0 %v408_v45  ;;  %483 = vmatpush.msra.mxu1 %v409_v46 }
  0x56   : > { %503 = vmatpush.msra.mxu2 %v410_v47 }
  0x57   : > { %464 = vmatpush.msra.mxu0 %v405_v48  ;;  %484 = vmatpush.msra.mxu1 %v406_v49 }
  0x58   : > { %504 = vmatpush.msra.mxu2 %v407_v50 }
  0x59   : > { %465 = vmatpush.msra.mxu0 %v402_v51  ;;  %485 = vmatpush.msra.mxu1 %v403_v52 }
  0x5a   : > { %505 = vmatpush.msra.mxu2 %v404_v53 }
  0x5b   : > { %466 = vmatpush.msra.mxu0 %v399_v54  ;;  %486 = vmatpush.msra.mxu1 %v400_v55 }
  0x5c   : > { %506 = vmatpush.msra.mxu2 %v401_v56 }
  0x5d   : > { %467 = vmatpush.msra.mxu0 %v396_v57  ;;  %487 = vmatpush.msra.mxu1 %v397_v58 }
  0x5e   : > { %507 = vmatpush.msra.mxu2 %v398_v59 }
  0xb1   : > { %v360_v14 = vpop.xlane.xlu0 %359 }
  0xb2   : > { %v368_v15 = vmul.f32 %v1575_v13, %v360_v14  ;;  %v446_v14 = vperm.slane %v444_v12, 0 }
  0xb4   : > { %v1579_v16 = vsub.f32 %v1572_v0, %v368_v15 }
  0xb6   : > { %v370_v17 = vmul.f32 %v1579_v16, %v1579_v16 }
  0xb8   : > { %371 = vadd.xlane.f32.xlu0 %v370_v17 }
 0x12b   : > { %v372_v60 = vpop.xlane.xlu0 %371 }
 0x12c   : > { %v373_v61 = vmul.f32 %v372_v60, %v1575_v13  ;;  %v447_v13 = vperm.slane %v444_v12, 1 }
 0x12e   : > { %v374_v62 = vadd.f32 1e-05, %v373_v61 }
 0x130   : > { %1140 = vrsqrt.f32 %v374_v62  ;;  %vm381_vm2 = vweird.f32 %v374_v62 }
 0x136   : > { %v1141_v63 = vpop.eup %1140 }
 0x137   : > { %v376_v1 = vmul.f32 %v1141_v63, %v374_v62  ;;  %vm382_vm1 = vweird.f32 %v1141_v63 }
 0x138   : > { %vm383_vm3 = vmor %vm381_vm2, %vm382_vm1 }
 0x139   : > { %v377_v2 = vmul.f32 %v1141_v63, %v376_v1 }
 0x13b   : > { %v378_v3 = vmul.f32 0.5, %v377_v2 }
 0x13d   : > { %v379_v4 = vsub.f32 1.5, %v378_v3 }
 0x13f   : > { %v380_v5 = vmul.f32 %v1141_v63, %v379_v4 }
 0x141   : > { %v384_v7 = vsel %vm383_vm3, %v1141_v63, %v380_v5 }
 0x142   : > { %v385_v8 = vmul.f32 %v384_v7, %v1579_v16 }
 0x144   : > { %v390_v10 = vmul.f32 %v1135_v6, %v385_v8 }
 0x146   : > { %v395_v11 = vadd.f32 %v1136_v9, %v390_v10 }
 0x148   : > { %468 = vmatmul.f32.vlgmr.msra.gmra.mxu0 %v395_v11  ;;  %488 = vmatmul.f32.vlgmr.msra.gmra.mxu1 %v395_v11 }
 0x149   : > { %508 = vmatmul.f32.vlgmr.msra.gmra.mxu2 %v395_v11 }
 0x1c5   : > { %v489_v15 = vpop.f32.mrf.mxu1  ;;  %v469_v17 = vpop.f32.mrf.mxu0 }
 0x1c6   : > { %v1588_v18 = vadd.f32 %v489_v15, %v447_v13  ;;  %v470_v16 = vadd.f32 %v469_v17, %v446_v14 }
 0x1c8   : > { %590 = vrot.lane.b32.xlu1 %v1588_v18, %s1393_s15  ;;  %1024 = vmatpush.xpose.msk.msrb.mxu0 %vm512_vm4, %v1588_v18 }
 0x1cb   : > { %1025 = vmatmul.msk.f32.vlgmr.msrb.gmra.mxu0 %vm512_vm4, %v470_v16 }
 0x1cc   : > { %v509_v20 = vpop.f32.mrf.mxu2 }
 0x1cd   : > { %v1595_v21 = vadd.f32 %v509_v20, %v448_v19 }
 0x1cf   : > { %641 = vrot.lane.b32.xlu0 %v1595_v21, %s1393_s15  ;;  %582 = vmatpush.msrb.mxu2 %v1595_v21 }
 0x1d0   : > { %588 = vrot.lane.b32.xlu1 %v470_v16, %s1393_s15 }
 0x1d8   : > { %675 = vrot.lane.b32.xlu1 %v1588_v18, %s1394_s14 }
 0x1e0   : > { %673 = vrot.lane.b32.xlu1 %v470_v16, %s1394_s14 }
 0x1e8   : > { %757 = vrot.lane.b32.xlu1 %v470_v16, %s1395_s18 }
 0x23a   : > { %v591_v22 = vpop.permute.xlu1 %590 }
 0x23b   : > { %1027 = vmatpush.xpose.msk.msrb.mxu1 %vm512_vm4, %v591_v22 }
 0x241   : > { %v642_v23 = vpop.permute.xlu0 %641 }
 0x242   : > { %662 = vmatpush.msra.mxu3 %v642_v23  ;;  %v589_v24 = vpop.permute.xlu1 %588 }
 0x243   : > { %1028 = vmatmul.msk.f32.vlgmr.msrb.gmra.mxu1 %vm512_vm4, %v589_v24 }
 0x248   : > { %v536_v25 = vpop.f32.mrf.mxu0 }
 0x249   : > { %v540_v26 = vsel %vm539_vm5, %v536_v25, -inf }
 0x24a   : > { %v676_v27 = vpop.permute.xlu1 %675  ;;  %541 = vmax.xlane.f32.xlu0 %v540_v26 }
 0x24b   : > { %1030 = vmatpush.xpose.msk.msrb.mxu3 %vm512_vm4, %v676_v27 }
 0x252   : > { %v674_v54 = vpop.permute.xlu1 %673 }
 0x25a   : > { %v758_v59 = vpop.permute.xlu1 %757 }
 0x2bd   : > { %v542_v28 = vpop.xlane.xlu0 %541 }
 0x2be   : > { %v543_v29 = vsub.f32 %v536_v25, %v542_v28 }
 0x2c0   : > { %v544_v30 = vmul.f32 1.442695, %v543_v29  ;;  %v613_v31 = vpop.f32.mrf.mxu1 }
 0x2c1   : > { %v616_v32 = vsel %vm539_vm5, %v613_v31, -inf }
 0x2c2   : > { %1142 = vpow2.f32 %v544_v30  ;;  %617 = vmax.xlane.f32.xlu2 %v616_v32 }
 0x2c8   : > { %v1143_v33 = vpop.eup %1142 }
 0x2c9   : > { %v546_v34 = vsel %vm539_vm5, %v1143_v33, 0.0 }
 0x2ca   : > { %547 = vadd.xlane.f32.xlu0 %v546_v34 }
 0x2de   : > { %809 = vrot.lane.b32.xlu0 %v1595_v21, %s1395_s18 }
 0x335   : > { %v618_v35 = vpop.xlane.xlu2 %617 }
 0x336   : > { %v619_v36 = vsub.f32 %v613_v31, %v618_v35 }
 0x338   : > { %v620_v37 = vmul.f32 1.442695, %v619_v36 }
 0x33a   : > { %1144 = vpow2.f32 %v620_v37 }
 0x33d   : > { %v548_v38 = vpop.xlane.xlu0 %547 }
 0x33e   : > { %1146 = vrcp.f32 %v548_v38  ;;  %v560_v44 = vand.u32 2147483648, %v548_v38  ;;  %v558_v46 = vand.u32 2147483647, %v548_v38  ;;  %vm554_vm7 = vweird.f32 %v548_v38 }
 0x340   : > { %v1145_v39 = vpop.eup %1144  ;;  %v561_v48 = vor.u32 1.1754944e-38, %v560_v44  ;;  %vm559_vm9 = vcmp.eq.f32.partialorder %v558_v46, 8.507059e+37 }
 0x341   : > { %v622_v40 = vsel %vm539_vm5, %v1145_v39, 0.0 }
 0x342   : > { %623 = vadd.xlane.f32.xlu2 %v622_v40 }
 0x344   : > { %v1147_v41 = vpop.eup %1146 }
 0x345   : > { %v550_v42 = vmul.f32 %v1147_v41, %v548_v38  ;;  %vm555_vm6 = vweird.f32 %v1147_v41 }
 0x346   : > { %vm556_vm8 = vmor %vm554_vm7, %vm555_vm6  ;;  %vm671_vm7 = vcmask 523520  }
 0x347   : > { %v551_v43 = vsub.f32 1.0, %v550_v42 }
 0x349   : > { %v552_v45 = vmul.f32 %v1147_v41, %v551_v43 }
 0x34b   : > { %v553_v47 = vadd.f32 %v1147_v41, %v552_v45 }
 0x34d   : > { %v557_v49 = vsel %vm556_vm8, %v1147_v41, %v553_v47  ;;  %vm839_vm8 = vcmask 1048320  }
 0x34e   : > { %v562_v50 = vsel %vm559_vm9, %v561_v48, %v557_v49  ;;  %v857_v49 = vld [vmem:[#allocation11 + $0x78] sm:$0xff] }
 0x34f   : > { %v563_v51 = vmul.f32 %v1143_v33, %v562_v50  ;;  %v856_v50 = vld [vmem:[#allocation11 + $0x70] sm:$0xff] }
 0x350   : > { %v810_v52 = vpop.permute.xlu0 %809 }
 0x351   : > { %1026 = vmatmul.msk.f32.vlgmr.msrb.gmra.mxu2 %vm539_vm5, %v563_v51  ;;  %v855_v51 = vld [vmem:[#allocation11 + $0x68] sm:$0xff] }
 0x352   : > { %830 = vmatpush.msra.mxu2 %v810_v52  ;;  %v854_v52 = vld [vmem:[#allocation11 + $0x60] sm:$0xff] }
 0x35a   : > { %759 = vrot.lane.b32.xlu2 %v1588_v18, %s1395_s18 }
 0x3b5   : > { %v624_v53 = vpop.xlane.xlu2 %623 }
 0x3b6   : > { %1148 = vrcp.f32 %v624_v53  ;;  %v636_v60 = vand.u32 2147483648, %v624_v53  ;;  %v634_v62 = vand.u32 2147483647, %v624_v53  ;;  %vm630_vm11 = vweird.f32 %v624_v53 }
 0x3b8   : > { %v637_v1 = vor.u32 1.1754944e-38, %v636_v60  ;;  %vm635_vm13 = vcmp.eq.f32.partialorder %v634_v62, 8.507059e+37  ;;  %v846_v60 = vld [vmem:[#allocation11 + $0x20] sm:$0xff]  ;;  %v844_v62 = vld [vmem:[#allocation11 + $0x10] sm:$0xff] }
 0x3bc   : > { %v1149_v55 = vpop.eup %1148 }
 0x3bd   : > { %v626_v56 = vmul.f32 %v1149_v55, %v624_v53  ;;  %v760_v57 = vpop.permute.xlu2 %759  ;;  %vm631_vm10 = vweird.f32 %v1149_v55  ;;  %v853_v53 = vld [vmem:[#allocation11 + $0x58] sm:$0xff] }
 0x3be   : > { %1033 = vmatpush.xpose.msk.msra.mxu1 %vm512_vm4, %v760_v57  ;;  %vm632_vm12 = vmor %vm630_vm11, %vm631_vm10  ;;  %v849_v57 = vld [vmem:[#allocation11 + $0x38] sm:$0xff] }
 0x3bf   : > { %v627_v58 = vsub.f32 1.0, %v626_v56  ;;  %v850_v56 = vld [vmem:[#allocation11 + $0x40] sm:$0xff] }
 0x3c1   : > { %v628_v61 = vmul.f32 %v1149_v55, %v627_v58  ;;  %1034 = vmatmul.msk.f32.vlgmr.msra.gmra.mxu1 %vm512_vm4, %v758_v59  ;;  %v848_v58 = vld [vmem:[#allocation11 + $0x30] sm:$0xff]  ;;  %v847_v59 = vld [vmem:[#allocation11 + $0x28] sm:$0xff] }
 0x3c3   : > { %v629_v63 = vadd.f32 %v1149_v55, %v628_v61  ;;  %v845_v61 = vld [vmem:[#allocation11 + $0x18] sm:$0xff] }
 0x3c5   : > { %v633_v2 = vsel %vm632_vm12, %v1149_v55, %v629_v63  ;;  %v851_v55 = vld [vmem:[#allocation11 + $0x48] sm:$0xff] }
 0x3c6   : > { %v638_v3 = vsel %vm635_vm13, %v637_v1, %v633_v2  ;;  %v843_v63 = vld [vmem:[#allocation11 + $0x8] sm:$0xff]  ;;  %v842_v1 = vld [vmem:[#allocation11] sm:$0xff] }
 0x3c7   : > { %v639_v4 = vmul.f32 %v1145_v39, %v638_v3 }
 0x3c9   : > { %1029 = vmatmul.msk.f32.vlgmr.msra.gmra.mxu3 %vm539_vm5, %v639_v4 }
 0x3ca   : > { %862 = vmatpush.msra.mxu3 %v857_v49 }
 0x3cc   : > { %863 = vmatpush.msra.mxu3 %v856_v50 }
 0x3ce   : > { %864 = vmatpush.msra.mxu3 %v855_v51 }
 0x3d0   : > { %865 = vmatpush.msra.mxu3 %v854_v52 }
 0x3d1   : > { %1031 = vmatmul.msk.f32.vlgmr.msrb.gmra.mxu3 %vm512_vm4, %v674_v54  ;;  %v852_v54 = vld [vmem:[#allocation11 + $0x50] sm:$0xff] }
 0x3d2   : > { %866 = vmatpush.msra.mxu3 %v853_v53 }
 0x3d4   : > { %v584_v5 = vpop.f32.mrf.mxu2  ;;  %867 = vmatpush.msra.mxu3 %v852_v54 }
 0x3d5   : > { %587 = vst.msk [vmem:[#allocation2] sm:$0xff] %vm512_vm4, %v584_v5  ;;  %v1137_v5 = vld [vmem:[%s1678_s6] ss:$0 sm:$0xff] }
 0x3d6   : > { %868 = vmatpush.msra.mxu3 %v851_v55 }
 0x3d8   : > { %869 = vmatpush.msra.mxu3 %v850_v56 }
 0x3da   : > { %870 = vmatpush.msra.mxu3 %v849_v57 }
 0x3dc   : > { %871 = vmatpush.msra.mxu3 %v848_v58 }
 0x3de   : > { %872 = vmatpush.msra.mxu3 %v847_v59 }
 0x3e0   : > { %873 = vmatpush.msra.mxu3 %v846_v60 }
 0x3e2   : > { %874 = vmatpush.msra.mxu3 %v845_v61 }
 0x3e4   : > { %875 = vmatpush.msra.mxu3 %v844_v62 }
 0x3e6   : > { %876 = vmatpush.msra.mxu3 %v843_v63 }
 0x3e8   : > { %877 = vmatpush.msra.mxu3 %v842_v1 }
 0x43e   : > { %v782_v6 = vpop.f32.mrf.mxu1 }
 0x43f   : > { %v785_v7 = vsel %vm539_vm5, %v782_v6, -inf }
 0x440   : > { %786 = vmax.xlane.f32.xlu1 %v785_v7 }
 0x44c   : > { %v664_v8 = vpop.f32.mrf.mxu3 }
 0x454   : > { %v698_v9 = vpop.f32.mrf.mxu3 }
 0x455   : > { %v701_v10 = vsel %vm539_vm5, %v698_v9, -inf }
 0x456   : > { %702 = vmax.xlane.f32.xlu2 %v701_v10 }
 0x4b3   : > { %v787_v11 = vpop.xlane.xlu1 %786 }
 0x4b4   : > { %v788_v12 = vsub.f32 %v782_v6, %v787_v11 }
 0x4b6   : > { %v789_v13 = vmul.f32 1.442695, %v788_v12 }
 0x4b8   : > { %1150 = vpow2.f32 %v789_v13 }
 0x4be   : > { %v1151_v14 = vpop.eup %1150 }
 0x4bf   : > { %v791_v15 = vsel %vm539_vm5, %v1151_v14, 0.0 }
 0x4c0   : > { %792 = vadd.xlane.f32.xlu2 %v791_v15 }
 0x4c9   : > { %v703_v17 = vpop.xlane.xlu2 %702 }
 0x4ca   : > { %v704_v18 = vsub.f32 %v698_v9, %v703_v17 }
 0x4cc   : > { %v705_v16 = vmul.f32 1.442695, %v704_v18 }
 0x4ce   : > { %1152 = vpow2.f32 %v705_v16 }
 0x4d4   : > { %v1153_v19 = vpop.eup %1152 }
 0x4d5   : > { %v707_v20 = vsel %vm539_vm5, %v1153_v19, 0.0 }
 0x4d6   : > { %708 = vadd.xlane.f32.xlu1 %v707_v20 }
 0x4d8   : > { %725 = vrot.lane.b32.xlu2 %v1595_v21, %s1394_s14 }
 0x4ef   : > { %668 = vrot.lane.b32.xlu1 %v664_v8, %s1395_s18 }
 0x533   : > { %v793_v22 = vpop.xlane.xlu2 %792 }
 0x534   : > { %1154 = vrcp.f32 %v793_v22  ;;  %v805_v27 = vand.u32 2147483648, %v793_v22  ;;  %v803_v29 = vand.u32 2147483647, %v793_v22  ;;  %vm799_vm15 = vweird.f32 %v793_v22 }
 0x536   : > { %v806_v31 = vor.u32 1.1754944e-38, %v805_v27  ;;  %vm804_vm1 = vcmp.eq.f32.partialorder %v803_v29, 8.507059e+37 }
 0x53a   : > { %v1155_v23 = vpop.eup %1154 }
 0x53b   : > { %v795_v24 = vmul.f32 %v1155_v23, %v793_v22  ;;  %v726_v25 = vpop.permute.xlu2 %725  ;;  %vm800_vm14 = vweird.f32 %v1155_v23 }
 0x53c   : > { %746 = vmatpush.msra.mxu0 %v726_v25  ;;  %vm801_vm0 = vmor %vm799_vm15, %vm800_vm14 }
 0x53d   : > { %v796_v26 = vsub.f32 1.0, %v795_v24 }
 0x53f   : > { %v797_v28 = vmul.f32 %v1155_v23, %v796_v26 }
 0x541   : > { %v798_v30 = vadd.f32 %v1155_v23, %v797_v28 }
 0x543   : > { %v802_v32 = vsel %vm801_vm0, %v1155_v23, %v798_v30 }
 0x544   : > { %v807_v21 = vsel %vm804_vm1, %v806_v31, %v802_v32 }
 0x545   : > { %v808_v33 = vmul.f32 %v1151_v14, %v807_v21 }
 0x547   : > { %1035 = vmatmul.msk.f32.vlgmr.msra.gmra.mxu2 %vm539_vm5, %v808_v33 }
 0x549   : > { %v709_v34 = vpop.xlane.xlu1 %708 }
 0x54a   : > { %1156 = vrcp.f32 %v709_v34  ;;  %v721_v38 = vand.u32 2147483648, %v709_v34  ;;  %v719_v40 = vand.u32 2147483647, %v709_v34  ;;  %vm715_vm3 = vweird.f32 %v709_v34 }
 0x54c   : > { %v722_v42 = vor.u32 1.1754944e-38, %v721_v38  ;;  %vm720_vm6 = vcmp.eq.f32.partialorder %v719_v40, 8.507059e+37 }
 0x550   : > { %v1157_v35 = vpop.eup %1156 }
 0x551   : > { %v711_v36 = vmul.f32 %v1157_v35, %v709_v34  ;;  %vm716_vm2 = vweird.f32 %v1157_v35 }
 0x552   : > { %vm717_vm4 = vmor %vm715_vm3, %vm716_vm2 }
 0x553   : > { %v712_v37 = vsub.f32 1.0, %v711_v36 }
 0x555   : > { %v713_v39 = vmul.f32 %v1157_v35, %v712_v37 }
 0x557   : > { %v714_v41 = vadd.f32 %v1157_v35, %v713_v39 }
 0x559   : > { %v718_v43 = vsel %vm717_vm4, %v1157_v35, %v714_v41 }
 0x55a   : > { %v723_v44 = vsel %vm720_vm6, %v722_v42, %v718_v43 }
 0x55b   : > { %v724_v45 = vmul.f32 %v1153_v19, %v723_v44 }
 0x55d   : > { %1032 = vmatmul.msk.f32.vlgmr.msra.gmra.mxu0 %vm539_vm5, %v724_v45  ;;  %vm755_vm5 = vcmask 785920  }
 0x561   : > { %v669_v46 = vpop.permute.xlu1 %668 }
 0x562   : > { %672 = vst.msk [vmem:[#allocation2] sm:$0xff] %vm671_vm7, %v669_v46 }
 0x5ca   : > { %v832_v47 = vpop.f32.mrf.mxu2 }
 0x5cb   : > { %836 = vrot.lane.b32.xlu2 %v832_v47, %s1393_s15 }
 0x5da   : > { %v748_v48 = vpop.f32.mrf.mxu0 }
 0x5db   : > { %752 = vrot.lane.b32.xlu0 %v748_v48, %s1394_s14 }
 0x625   : > { %v837_v3 = vpop.permute.xlu2 %836 }
 0x64d   : > { %v753_v2 = vpop.permute.xlu0 %752 }
 0x64e   : > { %756 = vst.msk [vmem:[#allocation2] sm:$0xff] %vm755_vm5, %v753_v2 }
 0x64f   : > { %840 = vst.msk [vmem:[#allocation2] sm:$0xff] %vm839_vm8, %v837_v3 }
 0x656   : > { %v841_v4 = vld [vmem:[#allocation2] sm:$0xff] }
 0x657   : > { %878 = vmatmul.f32.vlgmr.msra.gmra.mxu3 %v841_v4 }
 0x6da   : > { %v879_v6 = vpop.f32.mrf.mxu3 }
 0x6db   : > { %v880_v7 = vadd.f32 %v1137_v5, %v879_v6 }
 0x6dd   : > { %v882_v8 = vadd.f32 %v880_v7, %v1572_v0 }
 0x6df   : > { %883 = vst [vmem:[%s357_s21] sm:$0xff] %v882_v8 }
 0x6e0   : > { %1335 = shalt.err (!%p1332_p9)
}
 0x6e1   : > { %1058 = dma.vmem_to_hbm [thread:$0]  (%p1523_p5), %s898_s13, 128, %s900_s1, %s885_s8  }
 0x6e2 PF: > { %s911_s22 = sand.u32 1, %s1370_s24   ;;  %p1691_p10 = scmp.ge.s32.totalorder %s1382_s27, 2 }
 0x6e3   : > { %s912_s19 = scalar_lea.sflag [#allocation5], %s911_s22 }
 0x6e4   : > { %p1078_p13 = pnand %p1691_p10, %p1527_p6 }
 0x6e6   : > { %p1079_p11 = pneg %p1078_p13 }
 0x6e8   : > { %1365 = dma.done.wait (%p1079_p11), %s912_s19, 128  }
 0x6e9   : > { %1367 = vsyncadd (%p1079_p11), %s912_s19, 4294967168  ;;  %p22_p0 = scmp.ge.s32.totalorder %s1497_s17, 4   ;;  %s1692_s24 = smov %s1374_s25 }
 0x6ea   : > { %s1693_s25 = smov %s1378_s26  ;;  %s1694_s26 = smov %s1508_s20 }
 0x6eb   : > { %s1695_s27 = smov %s1497_s17  ;;  %24 = sbr.rel (!%p22_p0) target bundleno = 10 (0xa), region = 109 }
 0x6f0   :  { %918 = vsyncpa [#allocation4], 1 }
 0x6f1   :  { %920 = vsyncpa [#allocation4 + $0x1], 1 }
 0x6f2   :  { %921 = vsyncpa [#allocation7], 1 }
 0x6f3   :  { %922 = vsyncpa [#allocation10], 1 }
 0x6f4   :  { %923 = vsyncpa [#allocation5], 1 }
 0x6f5   :  { %925 = vsyncpa [#allocation5 + $0x1], 1 }

</bundles_post_ra>
